<compile_context>
chip_gen: v7x
topology: tpu7x:2x2x1
jax: 0.10.0
libtpu: 0.0.40
codegen_flags: <defaults>
</compile_context>

<pallas_src>
import functools

import jax
import jax.numpy as jnp
from jax import lax
from jax.experimental import pallas as pl
from jax.experimental.pallas import tpu as pltpu

TOPK = (1, 5)
_LANE = 128


def _round_up(x, m):
    return ((x + m - 1) // m) * m


def _accuracy_kernel(s_ref, t_ref, out_ref, acc_ref, *, batch, block_b, topk):
    i = pl.program_id(0)

    @pl.when(i == 0)
    def _init():
        acc_ref[...] = jnp.zeros_like(acc_ref)

    s = s_ref[...]                       # [TB, Cp] native dtype (f32 / bf16)
    t = t_ref[...]                       # [TB, Cp]
    tb, cp = s.shape

    col = lax.broadcasted_iota(jnp.int32, (tb, cp), 1)

    # labels = argmax(class_h_target, dim=1)  (first index on ties, like torch)
    tmax = jnp.max(t, axis=1, keepdims=True)                                # XLU
    label = jnp.min(jnp.where(t >= tmax, col, cp), axis=1, keepdims=True)   # XLU

    # Score of the target class (gather via masked max; label < real C).
    neg = jnp.array(-jnp.inf, s.dtype)
    tgt_score = jnp.max(jnp.where(col == label, s, neg),
                        axis=1, keepdims=True)                              # XLU

    # Rank of the target class = #scores strictly greater than it.
    # Count in f32 (exact for C < 2^24) regardless of the input dtype.
    n_greater = jnp.sum((s > tgt_score).astype(jnp.float32),
                        axis=1, keepdims=True)                              # XLU

    # Valid-row mask for the (zero-padded) final batch block.
    row = lax.broadcasted_iota(jnp.int32, (tb, 1), 0) + i * block_b
    valid = row < batch

    # Fold all top-k indicators into ONE sublane reduction: lane j holds the
    # indicator for topk[j]; all other lanes get threshold 0 -> always 0.
    lane = lax.broadcasted_iota(jnp.int32, (tb, _LANE), 1)
    thresh = jnp.zeros((tb, _LANE), jnp.float32)
    for j, k in enumerate(topk):
        thresh = jnp.where(lane == j, jnp.float32(k), thresh)
    hits = jnp.logical_and(n_greater < thresh, valid).astype(jnp.float32)
    acc_ref[...] += jnp.sum(hits, axis=0, keepdims=True)                    # XLU

    @pl.when(i == pl.num_programs(0) - 1)
    def _finalize():
        out_ref[...] = acc_ref[...] * jnp.float32(100.0 / batch)


def set_evaluation_forward(enc_score_p0, class_h_target, *, block_b=1024):
    """Mirror of SetEvaluation.forward for the 'OadTR' branch.

    Returns (res, metrics): res is None (as in the PyTorch module); metrics is
    {'acc': [prec@1, prec@5]} computed by the Pallas kernel.
    """
    s = enc_score_p0
    t = class_h_target
    if not jnp.issubdtype(s.dtype, jnp.floating):
        s = s.astype(jnp.float32)
    if not jnp.issubdtype(t.dtype, jnp.floating):
        t = t.astype(jnp.float32)

    B, C = s.shape

    # Lane-dense class axis (multiple of 128); padding never wins top-k/argmax.
    Cp = max(_LANE, _round_up(C, _LANE))
    if Cp != C:
        s = jnp.pad(s, ((0, 0), (0, Cp - C)), constant_values=-jnp.inf)
        t = jnp.pad(t, ((0, 0), (0, Cp - C)), constant_values=-jnp.inf)

    # Batch tile: largest multiple of 8 such that
    #   2 inputs x 2 pipeline buffers x TB x Cp x itemsize <= ~12 MiB
    # (fits v7x's smaller VMEM; vmem_limit raised below for v5e's 16 MiB default).
    itemsize = max(s.dtype.itemsize, t.dtype.itemsize)
    budget_tb = (12 * 1024 * 1024) // (4 * Cp * itemsize)
    tb = max(8, min(block_b, budget_tb, _round_up(B, 8)))
    tb = (tb // 8) * 8
    Bp = _round_up(B, tb)
    if Bp != B:
        s = jnp.pad(s, ((0, Bp - B), (0, 0)))   # padded rows masked in-kernel
        t = jnp.pad(t, ((0, Bp - B), (0, 0)))

    grid = (Bp // tb,)
    kernel = functools.partial(_accuracy_kernel, batch=B, block_b=tb, topk=TOPK)

    out = pl.pallas_call(
        kernel,
        out_shape=jax.ShapeDtypeStruct((1, _LANE), jnp.float32),
        grid=grid,
        in_specs=[
            pl.BlockSpec((tb, Cp), lambda i: (i, 0)),
            pl.BlockSpec((tb, Cp), lambda i: (i, 0)),
        ],
        out_specs=pl.BlockSpec((1, _LANE), lambda i: (0, 0)),
        scratch_shapes=[pltpu.VMEM((1, _LANE), jnp.float32)],
        compiler_params=pltpu.CompilerParams(
            dimension_semantics=("arbitrary",),   # batch axis carries the accumulator
            vmem_limit_bytes=32 * 1024 * 1024,    # v5e's default scoped VMEM is 16 MiB
        ),
        cost_estimate=pl.CostEstimate(
            flops=10 * Bp * Cp,
            transcendentals=0,
            bytes_accessed=2 * Bp * Cp * itemsize + 4 * _LANE,
        ),
    )(s, t)

    metrics = {"acc": [out[0, j] for j in range(len(TOPK))]}
    res = None  # faithful to the PyTorch forward, which returns None
    return res, metrics


def _reference_accuracy(scores, labels, topk=TOPK):
    """Pure-JAX reference (explicit top-k) for validation."""
    maxk = max(topk)
    B = labels.shape[0]
    _, pred = lax.top_k(scores, maxk)                 # [B, maxk]
    correct = (pred == labels[:, None])               # [B, maxk]
    out = []
    for k in topk:
        out.append(jnp.sum(correct[:, :k].astype(jnp.float32)) * (100.0 / B))
    return out


if __name__ == "__main__":
    key = jax.random.PRNGKey(0)
    B, C = 8, 32  # small shapes: batch=8, num_classes=32

    k_scores, k_labels, k_dec = jax.random.split(key, 3)
    enc_score_p0 = jax.random.normal(k_scores, (B, C), dtype=jnp.float32)
    labels = jax.random.randint(k_labels, (B,), 0, C)
    class_h_target = jax.nn.one_hot(labels, C, dtype=jnp.float32)
    # dec_scores / dec_target exist in the original signature but are unused
    dec_scores = jax.random.normal(k_dec, (B, C), dtype=jnp.float32)
    dec_target = class_h_target

    res, metrics = set_evaluation_forward(enc_score_p0, class_h_target)
    acc1, acc5 = metrics["acc"]
    jax.block_until_ready((acc1, acc5))

    ref1, ref5 = _reference_accuracy(enc_score_p0, labels)
    assert res is None
    assert abs(float(acc1) - float(ref1)) < 1e-4, (acc1, ref1)
    assert abs(float(acc5) - float(ref5)) < 1e-4, (acc5, ref5)

    print("KERNEL_OK")
</pallas_src>

<mosaic_0001>
module attributes {stable_mosaic.version = 11 : i64} {
  func.func @_accuracy_kernel(%arg0: i32, %arg1: memref<8x128xf32, #tpu.memory_space<vmem>>, %arg2: memref<8x128xf32, #tpu.memory_space<vmem>>, %arg3: memref<1x128xf32, #tpu.memory_space<vmem>>, %arg4: memref<1x128xf32, #tpu.memory_space<vmem>>) attributes {dimension_semantics = [#tpu.dimension_semantics<arbitrary>], iteration_bounds = array<i64: 1>, scalar_prefetch = 0 : i64, scratch_operands = 1 : i64, tpu.core_type = #tpu.core_type<tc>, window_params = [{transform_indices = @transform_0, window_bounds = array<i64: 8, 128>}, {transform_indices = @transform_1, window_bounds = array<i64: 8, 128>}, {pipeline_mode = #tpu.pipeline_mode<synchronous>, transform_indices = @transform_2, window_bounds = array<i64: 1, 128>}]} {
    %c0_i32 = arith.constant 0 : i32
    %0 = arith.cmpi eq, %arg0, %c0_i32 : i32
    %1 = arith.extui %0 : i1 to i32
    %c0_i32_0 = arith.constant 0 : i32
    %2 = arith.cmpi ne, %1, %c0_i32_0 : i32
    scf.if %2 {
      %cst_20 = arith.constant 0.000000e+00 : f32
      %56 = vector.broadcast %cst_20 : f32 to vector<1x128xf32>
      %c0_21 = arith.constant 0 : index
      %c0_22 = arith.constant 0 : index
      %57 = vector.load %arg4[%c0_21, %c0_22] : memref<1x128xf32, #tpu.memory_space<vmem>>, vector<1x128xf32>
      tpu.vector_store %arg4[%c0_21, %c0_22], %56 {strides = array<i32>} : memref<1x128xf32, #tpu.memory_space<vmem>>, vector<1x128xf32>,
    } else {
    }
    %c0 = arith.constant 0 : index
    %c0_1 = arith.constant 0 : index
    %3 = vector.load %arg1[%c0, %c0_1] : memref<8x128xf32, #tpu.memory_space<vmem>>, vector<8x128xf32>
    %c0_2 = arith.constant 0 : index
    %c0_3 = arith.constant 0 : index
    %4 = vector.load %arg2[%c0_2, %c0_3] : memref<8x128xf32, #tpu.memory_space<vmem>>, vector<8x128xf32>
    %5 = tpu.iota {dimensions = array<i32: 1>} : vector<8x128xi32>
    %cst = arith.constant dense<0xFF800000> : vector<8xf32>
    %6 = vector.multi_reduction <maximumf>, %4, %cst [1] : vector<8x128xf32> to vector<8xf32>
    %7 = vector.shape_cast %6 : vector<8xf32> to vector<8x1xf32>
    %8 = vector.broadcast %7 : vector<8x1xf32> to vector<8x128xf32>
    %9 = arith.cmpf oge, %4, %8 : vector<8x128xf32>
    %c128_i32 = arith.constant 128 : i32
    %10 = vector.broadcast %c128_i32 : i32 to vector<8x128xi32>
    %11 = arith.select %9, %5, %10 : vector<8x128xi1>, vector<8x128xi32>
    %cst_4 = arith.constant dense<2147483647> : vector<8xi32>
    %12 = vector.multi_reduction <minsi>, %11, %cst_4 [1] : vector<8x128xi32> to vector<8xi32>
    %13 = vector.shape_cast %12 : vector<8xi32> to vector<8x1xi32>
    %14 = vector.broadcast %13 : vector<8x1xi32> to vector<8x128xi32>
    %15 = arith.cmpi eq, %5, %14 : vector<8x128xi32>
    %cst_5 = arith.constant 0xFF800000 : f32
    %16 = vector.broadcast %cst_5 : f32 to vector<8x128xf32>
    %17 = arith.select %15, %3, %16 : vector<8x128xi1>, vector<8x128xf32>
    %cst_6 = arith.constant dense<0xFF800000> : vector<8xf32>
    %18 = vector.multi_reduction <maximumf>, %17, %cst_6 [1] : vector<8x128xf32> to vector<8xf32>
    %19 = vector.shape_cast %18 : vector<8xf32> to vector<8x1xf32>
    %20 = vector.broadcast %19 : vector<8x1xf32> to vector<8x128xf32>
    %21 = arith.cmpf ogt, %3, %20 : vector<8x128xf32>
    %22 = arith.extui %21 : vector<8x128xi1> to vector<8x128xi32>
    %23 = arith.sitofp %22 : vector<8x128xi32> to vector<8x128xf32>
    %cst_7 = arith.constant dense<0.000000e+00> : vector<8xf32>
    %24 = vector.multi_reduction <add>, %23, %cst_7 [1] : vector<8x128xf32> to vector<8xf32>
    %25 = vector.shape_cast %24 : vector<8xf32> to vector<8x1xf32>
    %26 = tpu.iota {dimensions = array<i32: 0>} : vector<8x1xi32>
    %c8_i32 = arith.constant 8 : i32
    %27 = arith.muli %arg0, %c8_i32 : i32
    %28 = vector.broadcast %27 : i32 to vector<8x1xi32>
    %29 = arith.addi %26, %28 : vector<8x1xi32>
    %c8_i32_8 = arith.constant 8 : i32
    %30 = vector.broadcast %c8_i32_8 : i32 to vector<8x1xi32>
    %31 = arith.cmpi slt, %29, %30 : vector<8x1xi32>
    %32 = tpu.iota {dimensions = array<i32: 1>} : vector<8x128xi32>
    %cst_9 = arith.constant 0.000000e+00 : f32
    %33 = vector.broadcast %cst_9 : f32 to vector<8x128xf32>
    %c0_i32_10 = arith.constant 0 : i32
    %34 = vector.broadcast %c0_i32_10 : i32 to vector<8x128xi32>
    %35 = arith.cmpi eq, %32, %34 : vector<8x128xi32>
    %cst_11 = arith.constant 1.000000e+00 : f32
    %36 = vector.broadcast %cst_11 : f32 to vector<8x128xf32>
    %37 = arith.select %35, %36, %33 : vector<8x128xi1>, vector<8x128xf32>
    %c1_i32 = arith.constant 1 : i32
    %38 = vector.broadcast %c1_i32 : i32 to vector<8x128xi32>
    %39 = arith.cmpi eq, %32, %38 : vector<8x128xi32>
    %cst_12 = arith.constant 5.000000e+00 : f32
    %40 = vector.broadcast %cst_12 : f32 to vector<8x128xf32>
    %41 = arith.select %39, %40, %37 : vector<8x128xi1>, vector<8x128xf32>
    %42 = vector.broadcast %25 : vector<8x1xf32> to vector<8x128xf32>
    %43 = arith.cmpf olt, %42, %41 : vector<8x128xf32>
    %44 = vector.broadcast %31 : vector<8x1xi1> to vector<8x128xi1>
    %45 = arith.andi %43, %44 : vector<8x128xi1>
    %46 = arith.extui %45 : vector<8x128xi1> to vector<8x128xi32>
    %47 = arith.sitofp %46 : vector<8x128xi32> to vector<8x128xf32>
    %c0_13 = arith.constant 0 : index
    %c0_14 = arith.constant 0 : index
    %48 = vector.load %arg4[%c0_13, %c0_14] : memref<1x128xf32, #tpu.memory_space<vmem>>, vector<1x128xf32>
    %cst_15 = arith.constant dense<0.000000e+00> : vector<128xf32>
    %49 = vector.multi_reduction <add>, %47, %cst_15 [0] : vector<8x128xf32> to vector<128xf32>
    %50 = vector.shape_cast %49 : vector<128xf32> to vector<1x128xf32>
    %51 = arith.addf %48, %50 : vector<1x128xf32>
    %c0_16 = arith.constant 0 : index
    %c0_17 = arith.constant 0 : index
    %52 = vector.load %arg4[%c0_16, %c0_17] : memref<1x128xf32, #tpu.memory_space<vmem>>, vector<1x128xf32>
    tpu.vector_store %arg4[%c0_16, %c0_17], %51 {strides = array<i32>} : memref<1x128xf32, #tpu.memory_space<vmem>>, vector<1x128xf32>,
    %c0_i32_18 = arith.constant 0 : i32
    %53 = arith.cmpi eq, %arg0, %c0_i32_18 : i32
    %54 = arith.extui %53 : i1 to i32
    %c0_i32_19 = arith.constant 0 : i32
    %55 = arith.cmpi ne, %54, %c0_i32_19 : i32
    scf.if %55 {
      %c0_20 = arith.constant 0 : index
      %c0_21 = arith.constant 0 : index
      %56 = vector.load %arg4[%c0_20, %c0_21] : memref<1x128xf32, #tpu.memory_space<vmem>>, vector<1x128xf32>
      %cst_22 = arith.constant 1.250000e+01 : f32
      %57 = vector.broadcast %cst_22 : f32 to vector<1x128xf32>
      %58 = arith.mulf %56, %57 : vector<1x128xf32>
      %c0_23 = arith.constant 0 : index
      %c0_24 = arith.constant 0 : index
      %59 = vector.load %arg3[%c0_23, %c0_24] : memref<1x128xf32, #tpu.memory_space<vmem>>, vector<1x128xf32>
      tpu.vector_store %arg3[%c0_23, %c0_24], %58 {strides = array<i32>} : memref<1x128xf32, #tpu.memory_space<vmem>>, vector<1x128xf32>,
    } else {
    }
    return
  }
  func.func @transform_0(%arg0: i32) -> (i32, i32) {
    %c0_i32 = arith.constant 0 : i32
    %c0_i32_0 = arith.constant 0 : i32
    return %arg0, %c0_i32 : i32, i32
  }
  func.func @transform_1(%arg0: i32) -> (i32, i32) {
    %c0_i32 = arith.constant 0 : i32
    %c0_i32_0 = arith.constant 0 : i32
    return %arg0, %c0_i32 : i32, i32
  }
  func.func @transform_2(%arg0: i32) -> (i32, i32) {
    %c0_i32 = arith.constant 0 : i32
    %c0_i32_0 = arith.constant 0 : i32
    %c0_i32_1 = arith.constant 0 : i32
    return %c0_i32, %c0_i32_0 : i32, i32
  }
}

</mosaic_0001>

<bundles_post_ra>
// kernel: tpu_custom_call.1
= control target key start
LH: loop header
LB: loop body
LE: loop exit
PB: predicated region body
PF: predicated region fallthrough
CT: control target
= control target key end

     0   :  { %7 = vsyncpa [#allocation4], 0  ;;  %s252_s0 = inlined_call_operand.hbm [shape: f32[8,128], index: 0, kind: input, shape index: {}]   ;;  %s253_s1 = inlined_call_operand.hbm [shape: f32[8,128], index: 1, kind: input, shape index: {}]   ;;  %s254_s2 = inlined_call_operand.hbm [shape: f32[1,128], index: 2, kind: output, shape index: {}]  }
   0x1   :  { %8 = vsyncpa [#allocation7], 0 }
   0x2   :  { %9 = vsyncpa [#allocation5], 0  ;;  %s197_s9 = smov [#allocation3]   ;;  %s198_s11 = smov [#allocation6]  }
   0x3   :  { %s16_s10 = sshll.u32 %s197_s9, 4  ;;  %s26_s12 = sshll.u32 %s198_s11, 4  ;;  %s17_s10 = int_to_ptr.vmem [resolvable:$true] %s16_s10  ;;  %s27_s12 = int_to_ptr.vmem [resolvable:$true] %s26_s12 }
   0x4   :  { %s125_s15 = scalar_lea.hbm %s252_s0, 128 }
   0x5   :  { %p126_p0 = scmp.ne.s32.totalorder %s252_s0, %s125_s15  ;;  %p129_p1 = scmp.lt.u32.totalorder %s125_s15, %s252_s0 }
   0x7   :  { %p131_p2 = pnand %p129_p1, %p126_p0 }
   0x9   :  { %134 = shalt.err (!%p131_p2)
}
   0xa   :  { %s135_s20 = scalar_lea.vmem %s17_s10, 128  ;;  %p140_p4 = scmp.lt.s32.totalorder %s17_s10, %s17_s10 }
   0xb   :  { %p136_p3 = scmp.ne.s32.totalorder %s17_s10, %s135_s20  ;;  %p141_p5 = scmp.lt.s32.totalorder %s135_s20, %s135_s20 }
   0xd   :  { %p142_p6 = por %p141_p5, %p140_p4 }
   0xf   :  { %p143_p7 = pnand %p142_p6, %p136_p3 }
  0x11   :  { %146 = shalt.err (!%p143_p7)
}
  0x12   :  { %19 = dma.hbm_to_vmem [thread:$0]  %s252_s0, 128, %s17_s10, [#allocation4]  }
  0x13   :  { %s147_s25 = scalar_lea.hbm %s253_s1, 128 }
  0x14   :  { %p148_p8 = scmp.ne.s32.totalorder %s253_s1, %s147_s25  ;;  %p151_p9 = scmp.lt.u32.totalorder %s147_s25, %s253_s1 }
  0x16   :  { %p153_p10 = pnand %p151_p9, %p148_p8 }
  0x18   :  { %156 = shalt.err (!%p153_p10)
}
  0x19   :  { %s157_s30 = scalar_lea.vmem %s27_s12, 128  ;;  %p162_p12 = scmp.lt.s32.totalorder %s27_s12, %s27_s12 }
  0x1a   :  { %p158_p11 = scmp.ne.s32.totalorder %s27_s12, %s157_s30  ;;  %p163_p13 = scmp.lt.s32.totalorder %s157_s30, %s157_s30 }
  0x1c   :  { %p164_p0 = por %p163_p13, %p162_p12 }
  0x1e   :  { %p165_p1 = pnand %p164_p0, %p158_p11 }
  0x20   :  { %168 = shalt.err (!%p165_p1)
}
  0x21   :  { %29 = dma.hbm_to_vmem [thread:$0]  %s253_s1, 128, %s27_s12, [#allocation7]  }
  0x22   :  { %191 = dma.done.wait [#allocation4], 128  }
  0x23   :  { %192 = vsyncadd [#allocation4], 4294967168 }
  0x24   :  { %193 = dma.done.wait [#allocation7], 128  }
  0x25   :  { %194 = vsyncadd [#allocation7], 4294967168  ;;  %v42_v0 = vld [vmem:[#allocation6] sm:$0xff]  ;;  %v43_v1 = vlaneseq  ;;  %v41_v16 = vld [vmem:[#allocation3] sm:$0xff]  ;;  %v199_v18 = vmov 0.0   ;;  %s200_s1 = smov [#allocation8]  }
  0x26   :  { %45 = vmax.xlane.f32.xlu0 %v42_v0  ;;  %40 = vst [vmem:[#allocation2] sm:$0x1] %v199_v18  ;;  %s109_s4 = sshll.u32 %s200_s1, 4  ;;  %s110_s4 = int_to_ptr.vmem [resolvable:$true] %s109_s4 }
  0x27   :  { %v44_v2 = vand.u32 127, %v43_v1  ;;  %s169_s5 = scalar_lea.vmem %s110_s4, 16  ;;  %s173_s6 = scalar_lea.vmem %s110_s4, 32 }
  0x28   :  { %p170_p2 = scmp.ne.s32.totalorder %s110_s4, %s169_s5  ;;  %p174_p3 = scmp.lt.s32.totalorder %s110_s4, %s110_s4 }
  0x29   :  { %vm78_vm4 = vcmp.eq.s32.totalorder %v44_v2, 0  ;;  %vm80_vm5 = vcmp.eq.s32.totalorder %v44_v2, 1  ;;  %p175_p4 = scmp.lt.s32.totalorder %s173_s6, %s169_s5 }
  0x2a   :  { %v79_v21 = vsel %vm78_vm4, 1.0, %v199_v18 }
  0x2b   :  { %v81_v22 = vsel %vm80_vm5, 5.0, %v79_v21  ;;  %p176_p5 = por %p175_p4, %p174_p3 }
  0x2d   :  { %v88_v30 = vld [vmem:[#allocation2] sm:$0x1]  ;;  %p177_p6 = pnand %p176_p5, %p170_p2 }
  0xb3   :  { %v46_v3 = vpop.xlane.xlu0 %45 }
  0xb4   :  { %vm47_vm0 = vcmp.ge.f32.partialorder %v42_v0, %v46_v3 }
  0xb5   :  { %v48_v4 = vsel %vm47_vm0, %v44_v2, 128 }
  0xb6   :  { %v50_v5 = vshra.s32 %v48_v4, 16  ;;  %v49_v7 = vand.u32 65535, %v48_v4 }
  0xb8   :  { %v52_v6 = vcvt.s32.f32 %v50_v5  ;;  %v51_v9 = vcvt.s32.f32 %v49_v7 }
  0xba   :  { %53 = vmin.xlane.f32.xlu0 %v52_v6 }
 0x147   :  { %v54_v8 = vpop.xlane.xlu0 %53 }
 0x148   :  { %vm55_vm1 = vcmp.eq.f32.partialorder %v52_v6, %v54_v8  ;;  %v60_v11 = vcvt.f32.s32 %v54_v8 }
 0x149   :  { %v56_v10 = vsel %vm55_vm1, %v51_v9, inf }
 0x14a   :  { %57 = vmin.xlane.f32.xlu1 %v56_v10  ;;  %v61_v13 = vshll.u32 %v60_v11, 16 }
 0x1d7   :  { %v58_v12 = vpop.xlane.xlu1 %57 }
 0x1d8   :  { %v59_v14 = vcvt.f32.s32 %v58_v12 }
 0x1da   :  { %v62_v15 = vadd.s32 %v61_v13, %v59_v14 }
 0x1dc   :  { %vm63_vm2 = vcmp.eq.s32.totalorder %v44_v2, %v62_v15 }
 0x1dd   :  { %v64_v17 = vsel %vm63_vm2, %v41_v16, -inf }
 0x1de   :  { %65 = vmax.xlane.f32.xlu1 %v64_v17 }
 0x26b   :  { %v66_v19 = vpop.xlane.xlu1 %65 }
 0x26c   :  { %vm67_vm3 = vcmp.gt.f32.partialorder %v41_v16, %v66_v19 }
 0x26d   :  { %v119_v20 = vsel %vm67_vm3, 1.0, %v199_v18 }
 0x26e   :  { %70 = vadd.xlane.f32.xlu0 %v119_v20 }
 0x2fb   :  { %v71_v23 = vpop.xlane.xlu0 %70 }
 0x2fc   :  { %vm82_vm6 = vcmp.lt.f32.partialorder %v71_v23, %v81_v22 }
 0x2fd   :  { %v120_v24 = vsel %vm82_vm6, 1.0, %v199_v18 }
 0x2fe   :  { %v89_v25 = vrot.slane %v120_v24, 4 }
 0x300   :  { %v90_v26 = vadd.f32 %v120_v24, %v89_v25 }
 0x302   :  { %v91_v27 = vrot.slane %v90_v26, 2 }
 0x304   :  { %v92_v28 = vadd.f32 %v91_v27, %v90_v26 }
 0x306   :  { %v93_v29 = vrot.slane %v92_v28, 1 }
 0x308   :  { %v94_v31 = vadd.f32 %v93_v29, %v92_v28 }
 0x30a   :  { %v95_v32 = vadd.f32 %v94_v31, %v88_v30 }
 0x30c   :  { %96 = vst [vmem:[#allocation2] sm:$0x1] %v95_v32 }
 0x313   :  { %v100_v33 = vld [vmem:[#allocation2] sm:$0x1] }
 0x314   :  { %v101_v34 = vmul.f32 12.5, %v100_v33 }
 0x316   :  { %102 = vst [vmem:[#allocation8] sm:$0x1] %v101_v34 }
 0x317   :  { %180 = shalt.err (!%p177_p6)
}
 0x318   :  { %s181_s9 = scalar_lea.hbm %s254_s2, 16 }
 0x319   :  { %p182_p7 = scmp.ne.s32.totalorder %s254_s2, %s181_s9  ;;  %p185_p8 = scmp.lt.u32.totalorder %s181_s9, %s254_s2 }
 0x31b   :  { %p187_p9 = pnand %p185_p8, %p182_p7 }
 0x31d   :  { %190 = shalt.err (!%p187_p9)
}
 0x31e   :  { %112 = dma.vmem_to_hbm [thread:$0]  %s110_s4, 16, %s254_s2, [#allocation5]  }
 0x31f   :  { %195 = dma.done.wait [#allocation5], 16  }
 0x320   :  { %196 = vsyncadd [#allocation5], 4294967280 }
 0x321   :  { %116 = vsyncpa [#allocation4], 1 }
 0x322   :  { %117 = vsyncpa [#allocation7], 1 }
 0x323   :  { %118 = vsyncpa [#allocation5], 1 }

</bundles_post_ra>
